<compile_context>
chip_gen: v7x
topology: tpu7x:2x2x1
jax: 0.10.0
libtpu: 0.0.40
codegen_flags: <defaults>
</compile_context>

<pallas_src>
import jax
import jax.numpy as jnp
from jax.experimental import pallas as pl
from jax.experimental.pallas import tpu as pltpu
import math


# ----------------------------------------------------------------------------
# Pallas kernel: one batch element per grid step.
# ----------------------------------------------------------------------------
def patch_embed_kernel(patches_ref,    # (Np, K)     bf16 im2col rows (this batch elem)
                       w_ref,          # (K, dim)    bf16 conv weight, pre-transposed
                       add_patch_ref,  # (Np, dim)   f32  conv_bias + pos_embedding[1:]
                       add_cls_ref,    # (1, dim)    f32  cls_token + pos_embedding[0]
                       o_ref):         # (Np+1, dim) output token slab
    # One MXU matmul per batch element; bf16 operands, f32 accumulation.
    proj = jnp.dot(patches_ref[...], w_ref[...],
                   preferred_element_type=jnp.float32)          # (Np, dim)
    proj = proj + add_patch_ref[...]
    # Row 0 = cls token (+ pos[0]); rows 1..Np = patch tokens (+ pos[1:]).
    # Single full-block, lane-dense store; no offset-1 sublane slicing.
    seq = jnp.concatenate([add_cls_ref[...], proj], axis=0)     # (Np+1, dim)
    o_ref[...] = seq.astype(o_ref.dtype)


# ----------------------------------------------------------------------------
# Wrapper
# ----------------------------------------------------------------------------
def patch_embedding(x, conv_w, conv_b, cls_token, pos_embedding, *, patch_size):
    B, C, H, W = x.shape
    P = patch_size
    Hp, Wp = H // P, W // P
    Np = Hp * Wp
    K = C * P * P
    dim = conv_w.shape[0]

    # im2col: pure layout plumbing (reshape/transpose, zero FLOPs), with the
    # bf16 cast fused in so the materialized buffer is half-size.  Row n of
    # batch b is the (C, P, P) patch at (n // Wp, n % Wp) flattened in
    # (c, i, j) order -- exactly the contraction order of Conv2d and the row
    # order produced by flatten(2).transpose(1, 2).
    patches = x.reshape(B, C, Hp, P, Wp, P)
    patches = jnp.transpose(patches, (0, 2, 4, 1, 3, 5))
    patches = patches.reshape(B, Np, K).astype(jnp.bfloat16)

    w2d = conv_w.reshape(dim, K).T.astype(jnp.bfloat16)          # (K, dim)
    # Fold the tiny per-token additive terms once in the wrapper (O(Np*dim)),
    # pre-splitting pos_embedding so the kernel never slices at offset 1.
    add_patch = (conv_b[None, :] + pos_embedding[0, 1:, :]).astype(jnp.float32)
    add_cls = (cls_token[0] + pos_embedding[0, 0:1, :]).astype(jnp.float32)

    out_bytes = B * (Np + 1) * dim * x.dtype.itemsize
    cost = pl.CostEstimate(
        flops=2 * B * Np * K * dim,
        transcendentals=0,
        bytes_accessed=(patches.size * 2 + w2d.size * 2
                        + add_patch.size * 4 + add_cls.size * 4 + out_bytes))

    return pl.pallas_call(
        patch_embed_kernel,
        out_shape=jax.ShapeDtypeStruct((B, Np + 1, dim), x.dtype),
        grid_spec=pltpu.PrefetchScalarGridSpec(
            num_scalar_prefetch=0,
            grid=(B,),
            in_specs=[
                pl.BlockSpec((None, Np, K), lambda b: (b, 0, 0)),
                pl.BlockSpec((K, dim), lambda b: (0, 0)),        # resident
                pl.BlockSpec((Np, dim), lambda b: (0, 0)),       # resident
                pl.BlockSpec((1, dim), lambda b: (0, 0)),        # resident
            ],
            out_specs=pl.BlockSpec((None, Np + 1, dim), lambda b: (b, 0, 0)),
        ),
        compiler_params=pltpu.CompilerParams(
            dimension_semantics=("parallel",)),
        cost_estimate=cost,
    )(patches, w2d, add_patch, add_cls)


# ----------------------------------------------------------------------------
# Pure-JAX reference (mirrors the PyTorch forward; independent f32 conv path)
# ----------------------------------------------------------------------------
def reference_patch_embedding(x, conv_w, conv_b, cls_token, pos_embedding, *,
                              patch_size):
    B = x.shape[0]
    dim = conv_w.shape[0]
    out = jax.lax.conv_general_dilated(
        x, conv_w,
        window_strides=(patch_size, patch_size),
        padding="VALID",
        dimension_numbers=("NCHW", "OIHW", "NCHW"),
        precision=jax.lax.Precision.HIGHEST,
    )
    out = out + conv_b[None, :, None, None]
    out = out.reshape(B, dim, -1)                 # flatten(2)
    out = jnp.transpose(out, (0, 2, 1))           # transpose(1, 2)
    cls = jnp.broadcast_to(cls_token, (B, 1, dim))
    out = jnp.concatenate([cls, out], axis=1)
    return out + pos_embedding


# ----------------------------------------------------------------------------
# Main
# ----------------------------------------------------------------------------
if __name__ == "__main__":
    B, C = 2, 4
    image_size, patch_size, dim = 16, 4, 128
    P = patch_size
    Np = (image_size // patch_size) ** 2          # 16 patches -> seq len 17

    key = jax.random.PRNGKey(0)
    k_w, k_b, k_cls, k_pos, k_x = jax.random.split(key, 5)

    fan_in = C * P * P
    bound = 1.0 / math.sqrt(fan_in)
    conv_w = jax.random.uniform(k_w, (dim, C, P, P), jnp.float32, -bound, bound)
    conv_b = jax.random.uniform(k_b, (dim,), jnp.float32, -bound, bound)
    cls_token = jax.random.normal(k_cls, (1, 1, dim), jnp.float32)
    pos_embedding = jax.random.normal(k_pos, (1, Np + 1, dim), jnp.float32)
    x = jax.random.normal(k_x, (B, C, image_size, image_size), jnp.float32)

    out = patch_embedding(x, conv_w, conv_b, cls_token, pos_embedding,
                          patch_size=patch_size)
    out = jax.block_until_ready(out)

    ref = reference_patch_embedding(x, conv_w, conv_b, cls_token, pos_embedding,
                                    patch_size=patch_size)
    assert out.shape == (B, Np + 1, dim)
    max_err = float(jnp.max(jnp.abs(out - ref)))
    # Kernel uses bf16 MXU operands (f32 accumulation); tolerance is set for
    # bf16 operand rounding against the f32 Precision.HIGHEST reference.
    assert jnp.allclose(out, ref, rtol=3e-2, atol=3e-2), max_err

    print("KERNEL_OK")
</pallas_src>

<mosaic_0001>
module attributes {stable_mosaic.version = 11 : i64} {
  func.func @patch_embed_kernel(%arg0: i32, %arg1: memref<1x16x64xbf16, #tpu.memory_space<vmem>>, %arg2: memref<64x128xbf16, #tpu.memory_space<vmem>>, %arg3: memref<16x128xf32, #tpu.memory_space<vmem>>, %arg4: memref<1x128xf32, #tpu.memory_space<vmem>>, %arg5: memref<1x17x128xf32, #tpu.memory_space<vmem>>) attributes {dimension_semantics = [#tpu.dimension_semantics<parallel>], iteration_bounds = array<i64: 2>, scalar_prefetch = 0 : i64, scratch_operands = 0 : i64, tpu.core_type = #tpu.core_type<tc>, window_params = [{transform_indices = @transform_0, window_bounds = array<i64: 1, 16, 64>}, {pipeline_mode = #tpu.pipeline_mode<synchronous>, transform_indices = @transform_1, window_bounds = array<i64: 64, 128>}, {pipeline_mode = #tpu.pipeline_mode<synchronous>, transform_indices = @transform_2, window_bounds = array<i64: 16, 128>}, {pipeline_mode = #tpu.pipeline_mode<synchronous>, transform_indices = @transform_3, window_bounds = array<i64: 1, 128>}, {transform_indices = @transform_4, window_bounds = array<i64: 1, 17, 128>}]} {
    %c0 = arith.constant 0 : index
    %c0_0 = arith.constant 0 : index
    %c0_1 = arith.constant 0 : index
    %0 = vector.load %arg1[%c0, %c0_0, %c0_1] : memref<1x16x64xbf16, #tpu.memory_space<vmem>>, vector<1x16x64xbf16>
    %1 = vector.shape_cast %0 : vector<1x16x64xbf16> to vector<16x64xbf16>
    %c0_2 = arith.constant 0 : index
    %c0_3 = arith.constant 0 : index
    %2 = vector.load %arg2[%c0_2, %c0_3] : memref<64x128xbf16, #tpu.memory_space<vmem>>, vector<64x128xbf16>
    %cst = arith.constant dense<0.000000e+00> : vector<16x128xf32>
    %3 = tpu.matmul %1, %2, %cst {dimension_numbers = #tpu.dot_dimension_numbers<[1], [0], [0], [1], [0, 0, 1, 1], [], []>} : vector<16x64xbf16>, vector<64x128xbf16>, vector<16x128xf32> -> vector<16x128xf32>
    %c0_4 = arith.constant 0 : index
    %c0_5 = arith.constant 0 : index
    %4 = vector.load %arg3[%c0_4, %c0_5] : memref<16x128xf32, #tpu.memory_space<vmem>>, vector<16x128xf32>
    %5 = arith.addf %3, %4 : vector<16x128xf32>
    %c0_6 = arith.constant 0 : index
    %c0_7 = arith.constant 0 : index
    %6 = vector.load %arg4[%c0_6, %c0_7] : memref<1x128xf32, #tpu.memory_space<vmem>>, vector<1x128xf32>
    %7 = tpu.concatenate %6, %5 in 0 : vector<1x128xf32>, vector<16x128xf32> -> vector<17x128xf32>
    %c0_8 = arith.constant 0 : index
    %c0_9 = arith.constant 0 : index
    %c0_10 = arith.constant 0 : index
    %8 = vector.load %arg5[%c0_8, %c0_9, %c0_10] : memref<1x17x128xf32, #tpu.memory_space<vmem>>, vector<1x17x128xf32>
    %9 = vector.shape_cast %8 : vector<1x17x128xf32> to vector<17x128xf32>
    %10 = vector.shape_cast %7 : vector<17x128xf32> to vector<1x17x128xf32>
    tpu.vector_store %arg5[%c0_8, %c0_9, %c0_10], %10 {strides = array<i32>} : memref<1x17x128xf32, #tpu.memory_space<vmem>>, vector<1x17x128xf32>,
    return
  }
  func.func @transform_0(%arg0: i32) -> (i32, i32, i32) {
    %c0_i32 = arith.constant 0 : i32
    %c0_i32_0 = arith.constant 0 : i32
    %c0_i32_1 = arith.constant 0 : i32
    return %arg0, %c0_i32, %c0_i32_0 : i32, i32, i32
  }
  func.func @transform_1(%arg0: i32) -> (i32, i32) {
    %c0_i32 = arith.constant 0 : i32
    %c0_i32_0 = arith.constant 0 : i32
    %c0_i32_1 = arith.constant 0 : i32
    return %c0_i32, %c0_i32_0 : i32, i32
  }
  func.func @transform_2(%arg0: i32) -> (i32, i32) {
    %c0_i32 = arith.constant 0 : i32
    %c0_i32_0 = arith.constant 0 : i32
    %c0_i32_1 = arith.constant 0 : i32
    return %c0_i32, %c0_i32_0 : i32, i32
  }
  func.func @transform_3(%arg0: i32) -> (i32, i32) {
    %c0_i32 = arith.constant 0 : i32
    %c0_i32_0 = arith.constant 0 : i32
    %c0_i32_1 = arith.constant 0 : i32
    return %c0_i32, %c0_i32_0 : i32, i32
  }
  func.func @transform_4(%arg0: i32) -> (i32, i32, i32) {
    %c0_i32 = arith.constant 0 : i32
    %c0_i32_0 = arith.constant 0 : i32
    %c0_i32_1 = arith.constant 0 : i32
    return %arg0, %c0_i32, %c0_i32_0 : i32, i32, i32
  }
}

</mosaic_0001>

<bundles_post_ra>
// kernel: tpu_custom_call.1
= control target key start
LH: loop header
LB: loop body
LE: loop exit
PB: predicated region body
PF: predicated region fallthrough
CT: control target
= control target key end

     0   :  { %9 = vsyncpa [#allocation3], 0  ;;  %s889_s0 = inlined_call_operand.hbm [shape: bf16[2,16,64], index: 0, kind: input, shape index: {}]   ;;  %s890_s1 = inlined_call_operand.hbm [shape: bf16[64,128], index: 1, kind: input, shape index: {}]   ;;  %s891_s2 = inlined_call_operand.hbm [shape: f32[16,128], index: 2, kind: input, shape index: {}]   ;;  %s892_s3 = inlined_call_operand.vmem [shape: f32[1,128], index: 3, kind: input, shape index: {}]   ;;  %s893_s4 = inlined_call_operand.vmem [shape: f32[2,17,128], index: 4, kind: output, shape index: {}]  }
   0x1   :  { %11 = vsyncpa [#allocation3 + $0x1], 0 }
   0x2   :  { %12 = vsyncpa [#allocation5], 0  ;;  %s705_s15 = smov 0   ;;  %s707_s16 = smov 0  }
   0x3   :  { %s709_s17 = smov 0   ;;  %s711_s18 = smov 0  }
   0x4 LB: > { %s724_s19 = sadd.s32 4294967295, %s669_s18   ;;  %p38_p0 = scmp.ne.s32.totalorder %s661_s16, %s657_s15  ;;  %s669_s18 = sphi %s711_s18, %s908_s18   ;;  %s665_s17 = sphi %s709_s17, %s907_s17   ;;  %s661_s16 = sphi %s707_s16, %s906_s16   ;;  %s657_s15 = sphi %s705_s15, %s905_s15  }
   0x5   : > { %p894_p1 = scmp.eq.s32.totalorder %s724_s19, 0  ;;  %p435_p2 = scmp.ge.s32.totalorder %s669_s18, 1 }
   0x6   : > { %p138_p3 = scmp.lt.s32.totalorder %s669_s18, 3  ;;  %s671_s22 = smov [#allocation4]  }
   0x7   : > { %p732_p4 = por %p894_p1, %p38_p0  ;;  %s150_s23 = sshll.u32 %s671_s22, 4  ;;  %s151_s23 = int_to_ptr.vmem [resolvable:$true] %s150_s23 }
   0x8   : > { %p736_p5 = pnand %p435_p2, %p138_p3  ;;  %s672_s25 = smov [#allocation6]  }
   0x9   : > { %s897_s20 = scalar_select %p732_p4, 1, 0 }
   0xa   : > { %s898_s21 = scalar_select %p736_p5, 1, 0 }
   0xb   : > { %p484_p6 = pneg %p736_p5  ;;  %s163_s26 = sshll.u32 %s672_s25, 4  ;;  %s748_s26 = int_to_ptr.vmem [resolvable:$true] %s163_s26 }
   0xc   : > { %s545_s29 = scalar_lea.hbm %s890_s1, 512 }
   0xd   : > { %p744_p7 = pnand %p484_p6, %p894_p1  ;;  %p546_p8 = scmp.ne.s32.totalorder %s890_s1, %s545_s29 }
   0xe   : > { %p552_p12 = scmp.lt.u32.totalorder %s545_s29, %s890_s1 }
   0xf   : > { %p547_p9 = pneg %p744_p7 }
  0x11   : > { %p548_p10 = pnand %p547_p9, %p546_p8 }
  0x13   : > { %p549_p11 = pneg %p548_p10 }
  0x15   : > { %p554_p13 = pnand %p552_p12, %p549_p11 }
  0x17   : > { %557 = shalt.err (!%p554_p13)
}
  0x18   : > { %s558_s8 = scalar_lea.vmem %s151_s23, 512  ;;  %p566_p6 = scmp.lt.s32.totalorder %s151_s23, %s151_s23 }
  0x19   : > { %p559_p0 = scmp.ne.s32.totalorder %s151_s23, %s558_s8  ;;  %p567_p1 = scmp.lt.s32.totalorder %s558_s8, %s558_s8 }
  0x1b   : > { %p561_p2 = pnand %p559_p0, %p547_p9  ;;  %p568_p4 = por %p567_p1, %p566_p6 }
  0x1d   : > { %p562_p3 = pneg %p561_p2 }
  0x1f   : > { %p569_p5 = pnand %p568_p4, %p562_p3 }
  0x21   : > { %572 = shalt.err (!%p569_p5)
}
  0x22   : > { %s673_s9 = smov 64   ;;  %s674_s10 = smov 4  }
  0x23   : > { %487 = dma.hbm_to_vmem [thread:$0]  (!%p744_p7), %s890_s1, 512, %s151_s23, [#allocation5], %s673_s9, %s673_s9, %s674_s10  }
  0x24   : > { %s573_s15 = scalar_lea.hbm %s891_s2, 256 }
  0x25   : > { %p574_p1 = scmp.ne.s32.totalorder %s891_s2, %s573_s15  ;;  %p580_p8 = scmp.lt.u32.totalorder %s573_s15, %s891_s2 }
  0x27   : > { %p576_p4 = pnand %p574_p1, %p547_p9 }
  0x29   : > { %p577_p5 = pneg %p576_p4 }
  0x2b   : > { %p582_p10 = pnand %p580_p8, %p577_p5 }
  0x2d   : > { %585 = shalt.err (!%p582_p10)
}
  0x2e   : > { %s586_s23 = scalar_lea.vmem %s748_s26, 256  ;;  %p594_p0 = scmp.lt.s32.totalorder %s748_s26, %s748_s26 }
  0x2f   : > { %p587_p11 = scmp.ne.s32.totalorder %s748_s26, %s586_s23  ;;  %p595_p2 = scmp.lt.s32.totalorder %s586_s23, %s586_s23 }
  0x31   : > { %p589_p12 = pnand %p587_p11, %p547_p9  ;;  %p596_p3 = por %p595_p2, %p594_p0 }
  0x33   : > { %p590_p13 = pneg %p589_p12 }
  0x35   : > { %p597_p6 = pnand %p596_p3, %p590_p13 }
  0x37   : > { %600 = shalt.err (!%p597_p6)
}
  0x38   : > { %s675_s29 = smov 128   ;;  %s676_s30 = smov 8  }
  0x39   : > { %490 = dma.hbm_to_vmem [thread:$0]  (!%p744_p7), %s891_s2, 256, %s748_s26, [#allocation5], %s675_s29, %s675_s29, %s676_s30  }
  0x3a   : > { %s801_s7 = sadd.s32 1, %s669_s18   ;;  %s25_s11 = sadd.s32 1, %s665_s17 }
  0x3b   : > { %s22_s8 = ssub.s32 %s669_s18, %s801_s7  ;;  %p32_p1 = scmp.ne.s32.totalorder %s665_s17, %s661_s16 }
  0x3c   : > { %p23_p9 = scmp.eq.s32.totalorder %s22_s8, 0  ;;  %p33_p4 = scmp.eq.s32.totalorder %s669_s18, 0 }
  0x3d   : > { %p497_p8 = scmp.lt.s32.totalorder %s669_s18, 2  ;;  %s180_s13 = sand.u32 1, %s665_s17  }
  0x3e   : > { %s810_s12 = scalar_select %p23_p9, %s665_s17, %s25_s11  }
  0x3f   : > { %p34_p5 = por %p33_p4, %p32_p1  ;;  %s455_s14 = sshll.u32 %s669_s18, 7 }
  0x40   : > { %s439_s15 = sshll.u32 %s180_s13, 3  ;;  %s818_s25 = scalar_lea.hbm %s889_s0, %s455_s14 }
  0x41   : > { %s184_s26 = scalar_lea.vmem [#allocation2], %s439_s15  ;;  %p820_p7 = pnand %p497_p8, %p34_p5 }
  0x42   : > { %s191_s27 = sshll.u32 %s184_s26, 4  ;;  %s826_s18 = scalar_lea.sflag [#allocation3], %s180_s13  ;;  %s824_s27 = int_to_ptr.vmem [resolvable:$true] %s191_s27 }
  0x43   : > { %s601_s23 = scalar_lea.hbm %s818_s25, 128  ;;  %p603_p11 = pneg %p820_p7 }
  0x44   : > { %p602_p10 = scmp.ne.s32.totalorder %s818_s25, %s601_s23  ;;  %s606_s5 = scalar_lea.hbm %s889_s0, 256 }
  0x45   : > { %p607_p0 = scmp.lt.u32.totalorder %s818_s25, %s889_s0  ;;  %p608_p2 = scmp.lt.u32.totalorder %s606_s5, %s601_s23 }
  0x46   : > { %p604_p12 = pnand %p603_p11, %p602_p10  ;;  %p610_p6 = scmp.lt.u32.totalorder %s601_s23, %s818_s25 }
  0x47   : > { %p609_p3 = por %p608_p2, %p607_p0 }
  0x48   : > { %p605_p13 = pneg %p604_p12 }
  0x49   : > { %p611_p9 = por %p610_p6, %p609_p3 }
  0x4b   : > { %p612_p1 = pnand %p611_p9, %p605_p13 }
  0x4d   : > { %615 = shalt.err (!%p612_p1)
}
  0x4e   : > { %s616_s11 = scalar_lea.vmem %s824_s27, 128  ;;  %s677_s13 = smov [#allocation2]  }
  0x4f   : > { %p617_p4 = scmp.ne.s32.totalorder %s824_s27, %s616_s11  ;;  %s621_s14 = sshll.u32 %s677_s13, 4  ;;  %s622_s14 = int_to_ptr.vmem [resolvable:$false] %s621_s14 }
  0x50   : > { %s623_s15 = scalar_lea.vmem %s622_s14, 256  ;;  %p624_p10 = scmp.lt.s32.totalorder %s824_s27, %s622_s14 }
  0x51   : > { %p619_p5 = pnand %p617_p4, %p603_p11  ;;  %p625_p12 = scmp.lt.s32.totalorder %s623_s15, %s616_s11 }
  0x53   : > { %p620_p8 = pneg %p619_p5  ;;  %p626_p0 = por %p625_p12, %p624_p10 }
  0x55   : > { %p627_p2 = pnand %p626_p0, %p620_p8 }
  0x57   : > { %630 = shalt.err (!%p627_p2)
}
  0x58   : > { %494 = dma.hbm_to_vmem [thread:$0]  (!%p820_p7), %s818_s25, 128, %s824_s27, %s826_s18, %s673_s9, %s673_s9, %s674_s10  }
  0x59   : > { %p901_p11 = scmp.ne.s32.totalorder %s898_s21, 0 }
  0x5a   : > { %s205_s24 = sand.u32 (!%p901_p11), 1, %s661_s16   ;;  %p902_p13 = scmp.ne.s32.totalorder (!%p901_p11), %s897_s20, 0 }
  0x5b   : > { %203 = sbr.rel (%p901_p11) target bundleno = 339 (0x153), region = 36  ;;  %s443_s22 = sshll.u32 (!%p901_p11), %s205_s24, 3 }
  0x5c   : > { %s206_s26 = scalar_lea.sflag (!%p901_p11), [#allocation3], %s205_s24  ;;  %s209_s23 = scalar_lea.vmem (!%p901_p11), [#allocation2], %s443_s22 }
  0x62   : > { %648 = dma.done.wait (%p902_p13), %s206_s26, 128  }
  0x63   : > { %650 = vsyncadd (%p902_p13), %s206_s26, 4294967168  ;;  %p903_p3 = scmp.eq.s32.totalorder %s724_s19, 0 }
  0x65   : > { %652 = dma.done.wait (%p903_p3), [#allocation5], 768   ;;  %p904_p6 = pmov %p903_p3 }
  0x66   : > { %v678_v0 = vmov 0.0   ;;  %vm679_vm0 = vmmov 0   ;;  %v540_v1 = vld [vmem:[#allocation4] sm:$0xff]   ;;  %v541_v2 = vld [vmem:[#allocation4 + $0x8] sm:$0xff]   ;;  %v542_v3 = vld [vmem:[#allocation4 + $0x10] sm:$0xff]   ;;  %vm289_vm1 = vcmask 523264  }
  0x67   : > { %654 = vsyncadd (%p904_p6), [#allocation5], 4294966528  ;;  %461 = vmatprep.subr.bf16.mxu0 %v678_v0  ;;  %469 = vmatprep.mubr.msk.bf16.mxu0 %vm679_vm0, %v678_v0  ;;  %v543_v4 = vld [vmem:[#allocation4 + $0x18] sm:$0xff]   ;;  %p242_p7 = scmp.lt.s32.totalorder %s724_s19, 1  ;;  %v258_v6 = vld [vmem:[#allocation6] sm:$0xff]  ;;  %vm337_vm2 = vcmask 1040384  }
  0x68   : > { %462 = vmatpush3.bf16.msra.mxu0 %v540_v1  ;;  %v544_v5 = vld [vmem:[%s209_s23] sm:$0xff]   ;;  %v259_v8 = vld [vmem:[#allocation6 + $0x8] sm:$0xff]  ;;  %v334_v11 = vld [vmem:[%s892_s3] sm:$0x1] }
  0x69   : > { %463 = vmatprep.subr.bf16.mxu0 %v678_v0  ;;  %s910_s19 = smov (!%p242_p7, %s724_s19), 1 }
  0x6a   : > { %s473_s20 = smul.u32 24, %s910_s19 }
  0x6c   : > { %464 = vmatpush3.bf16.msra.mxu0 %v541_v2  ;;  %s246_s27 = scalar_lea.vmem %s893_s4, %s473_s20 }
  0x6d   : > { %465 = vmatprep.subr.bf16.mxu0 %v678_v0 }
  0x70   : > { %466 = vmatpush3.bf16.msra.mxu0 %v542_v3 }
  0x71   : > { %467 = vmatprep.subr.bf16.mxu0 %v678_v0 }
  0x74   : > { %468 = vmatpush3.bf16.msra.mxu0 %v543_v4 }
  0x77   : > { %470 = vmatmul.mubr.msk.bf16.vlgmr.msra.gmra.mrb[0].mxu0 %vm289_vm1, %v544_v5 }
 0x14a   : > { %v327_v7 = vpop.f32.mrb[0].mxu0 }
 0x14b   : > { %v328_v9 = vadd.f32 %v327_v7, %v258_v6  ;;  %v471_v10 = vpop.f32.mrb[1].mxu0 }
 0x14c   : > { %v330_v12 = vpop.f32.mrb[2].mxu0 }
 0x14d   : > { %v338_v13 = vrot.slane %v328_v9, 7  ;;  %v331_v14 = vadd.f32 %v330_v12, %v259_v8  ;;  %v472_v15 = vpop.f32.mrb[3].mxu0 }
 0x14f   : > { %v344_v16 = vsel %vm337_vm2, %v334_v11, %v338_v13  ;;  %v339_v17 = vrot.slane %v331_v14, 7 }
 0x150   : > { %345 = vst [vmem:[%s246_s27] sm:$0xff] %v344_v16 }
 0x151   : > { %v340_v18 = vsel %vm337_vm2, %v338_v13, %v339_v17  ;;  %347 = vst [vmem:[%s246_s27 + $0x10] sm:$0x1] %v339_v17 }
 0x152   : > { %346 = vst [vmem:[%s246_s27 + $0x8] sm:$0xff] %v340_v18 }
 0x153 PF: > { %p15_p9 = scmp.ge.s32.totalorder %s801_s7, 4   ;;  %s905_s15 = smov %s661_s16 }
 0x154   : > { %s906_s16 = smov %s665_s17  ;;  %s907_s17 = smov %s810_s12 }
 0x155   : > { %s908_s18 = smov %s801_s7  ;;  %17 = sbr.rel (!%p15_p9) target bundleno = 4 (0x4), region = 84 }
 0x15c   :  { %369 = vsyncpa [#allocation3], 1 }
 0x15d   :  { %371 = vsyncpa [#allocation3 + $0x1], 1 }
 0x15e   :  { %372 = vsyncpa [#allocation5], 1 }

</bundles_post_ra>
